<compile_context>
chip_gen: v5e
topology: v5e:2x2
jax: 0.10.0
libtpu: 0.0.40
codegen_flags: <defaults>
</compile_context>

<pallas_src>
from functools import partial

import jax
import jax.numpy as jnp
import numpy as np
from jax.experimental import pallas as pl
from jax.experimental.pallas import tpu as pltpu

N_E = 128      # codebook size (n_e)
E_DIM = 32     # embedding dim (e_dim)
ALPHA = 0.9    # module's alpha
TM_MAX = 2048  # row tile; raise further on v6e/v7x (bump vmem_limit_bytes accordingly)


def _assign_core(z, wt, w, wsq):
    """Shared hard-assignment math on one (TM, D) tile.

    argmin_k ||z - W_k||^2 == argmin_k (||W_k||^2 - 2 z.W_k)   (||z||^2 is row-constant)
    """
    k = wt.shape[-1]
    zw = jnp.dot(z, wt, preferred_element_type=jnp.float32)              # (TM, K)  MXU
    score = wsq - 2.0 * zw                                                # (TM, K)
    min_val = jnp.min(score, axis=-1, keepdims=True)                      # (TM, 1)  XLU
    lane = jax.lax.broadcasted_iota(jnp.int32, (1, k), 1)                 # (1, K)
    # first-occurrence tie-break, kept 2-D throughout
    idx = jnp.min(jnp.where(score <= min_val, lane, k), axis=-1, keepdims=True)  # (TM, 1)
    onehot = (lane == idx).astype(jnp.float32)                            # (TM, K)
    quant = jnp.dot(onehot, w, preferred_element_type=jnp.float32)        # (TM, D)  MXU gather
    return quant, idx, min_val


def _quantize_train_kernel(x_ref, wt_ref, w_ref, wsq_ref, q_ref, err_ref, *, n_rows, tm):
    z = x_ref[...].astype(jnp.float32)                                    # (TM, D)
    quant, _, min_val = _assign_core(z, wt_ref[...], w_ref[...], wsq_ref[...])
    q_ref[...] = quant.astype(q_ref.dtype)

    # ||z - W_j||^2 == ||z||^2 + (||W_j||^2 - 2 z.W_j) == ||z||^2 + min_val
    row_err = jnp.sum(z * z, axis=-1, keepdims=True) + min_val            # (TM, 1)
    row_ids = pl.program_id(0) * tm + jax.lax.broadcasted_iota(jnp.int32, (tm, 1), 0)
    row_err = jnp.where(row_ids < n_rows, row_err, 0.0)                   # mask garbage tail rows
    # one lane-dense (8,128) store per tile: the tile's partial sum, broadcast
    err_ref[...] = jnp.broadcast_to(jnp.sum(row_err), err_ref.shape)


def _quantize_eval_kernel(x_ref, wt_ref, w_ref, wsq_ref, q_ref, idx_ref):
    z = x_ref[...].astype(jnp.float32)
    quant, idx, _ = _assign_core(z, wt_ref[...], w_ref[...], wsq_ref[...])
    q_ref[...] = quant.astype(q_ref.dtype)
    idx_ref[...] = idx.astype(jnp.int32)                                  # (TM, 1)


def _round_up(v, m):
    return ((v + m - 1) // m) * m


def quantize_forward(x, codebook, training=True, tm_max=TM_MAX, alpha=ALPHA):
    n, d = x.shape
    k, d2 = codebook.shape
    assert d == d2, "Z.shape[1] must equal e_dim"

    tm = min(tm_max, _round_up(max(n, 1), 8))          # multiple of 8 sublanes
    grid_n = pl.cdiv(n, tm)                            # partial last block handled by Pallas

    # Lane-dense codebook operands, computed once outside the grid.
    w = codebook.astype(jnp.float32)                   # (K, D)
    w_t = w.T                                          # (D, K)  lane-dense MXU operand
    w_sq = jnp.sum(w * w, axis=-1, keepdims=True).T    # (1, K)  ||W_k||^2

    in_specs = [
        pl.BlockSpec((tm, d), lambda i: (i, 0)),       # x tile (pipelined)
        pl.BlockSpec((d, k), lambda i: (0, 0)),        # w_t  (VMEM-resident)
        pl.BlockSpec((k, d), lambda i: (0, 0)),        # w    (VMEM-resident)
        pl.BlockSpec((1, k), lambda i: (0, 0)),        # w_sq (VMEM-resident)
    ]
    compiler_params = pltpu.CompilerParams(
        dimension_semantics=("parallel",),             # megacore / v7x 2-TC sharding
        vmem_limit_bytes=32 * 1024 * 1024,
    )

    if training:
        quant, err = pl.pallas_call(
            partial(_quantize_train_kernel, n_rows=n, tm=tm),
            grid=(grid_n,),
            out_shape=(
                jax.ShapeDtypeStruct((n, d), jnp.float32),          # quantize (W_j)
                jax.ShapeDtypeStruct((grid_n, 8, 128), jnp.float32),  # per-tile err partial sums
            ),
            in_specs=in_specs,
            out_specs=(
                pl.BlockSpec((tm, d), lambda i: (i, 0)),
                pl.BlockSpec((1, 8, 128), lambda i: (i, 0, 0)),
            ),
            compiler_params=compiler_params,
        )(x, w_t, w, w_sq)
        # forward value of L2(Z,sg(Wj)).sum(1).mean() + alpha*L2(sg(Z),Wj).sum(1).mean()
        diff = (1.0 + alpha) * (jnp.sum(err[:, 0, 0]) / max(n, 1))
        return quant, diff
    else:
        quant, idx = pl.pallas_call(
            _quantize_eval_kernel,
            grid=(grid_n,),
            out_shape=(
                jax.ShapeDtypeStruct((n, d), jnp.float32),   # quantize (W_j)
                jax.ShapeDtypeStruct((n, 1), jnp.int32),     # embed_ind
            ),
            in_specs=in_specs,
            out_specs=(
                pl.BlockSpec((tm, d), lambda i: (i, 0)),
                pl.BlockSpec((tm, 1), lambda i: (i, 0)),
            ),
            compiler_params=compiler_params,
        )(x, w_t, w, w_sq)
        return quant, idx[:, 0]


def init_codebook(key, n_e=N_E, e_dim=E_DIM):
    # nn.Embedding(n_e, e_dim).weight.data.uniform_(-1/n_e, 1/n_e)
    initrange = 1.0 / n_e
    return jax.random.uniform(
        key, (n_e, e_dim), dtype=jnp.float32, minval=-initrange, maxval=initrange
    )


def _check(x, codebook, quant, diff=None, idx=None, alpha=ALPHA, tag=""):
    """Tie-tolerant correctness check against an f64 reference.

    f32-level near-ties may legitimately pick a different (equally near) codeword
    than the exact argmin, so we assert optimality-to-tolerance, not index parity.
    """
    xf = np.asarray(x, dtype=np.float64)
    wf = np.asarray(codebook, dtype=np.float64)
    q = np.asarray(quant, dtype=np.float64)

    dist = ((xf[:, None, :] - wf[None, :, :]) ** 2).sum(-1)   # (N, K) exact reference
    d_min = dist.min(axis=-1)

    # 1) every returned row achieves (near-)minimal distance
    d_q = ((xf - q) ** 2).sum(-1)
    assert np.all(d_q <= d_min + 1e-4), f"{tag}: non-minimal codeword returned"
    # 2) every returned row is an actual codebook entry
    row_to_code = np.abs(q[:, None, :] - wf[None, :, :]).max(-1).min(-1)
    assert np.all(row_to_code <= 1e-6), f"{tag}: output row is not a codebook entry"
    if idx is not None:
        idxn = np.asarray(idx)
        assert np.all((idxn >= 0) & (idxn < wf.shape[0])), f"{tag}: index out of range"
        assert np.abs(q - wf[idxn]).max() <= 1e-6, f"{tag}: quant != codebook[embed_ind]"
    if diff is not None:
        d_ref = (1.0 + alpha) * d_min.mean()
        assert abs(float(diff) - d_ref) <= 1e-3 + 5e-4 * abs(d_ref), f"{tag}: diff mismatch"


if __name__ == "__main__":
    key = jax.random.PRNGKey(0)
    kx, kw, kx2 = jax.random.split(key, 3)
    codebook = init_codebook(kw)                                  # (128, 32)

    # --- small case: Z of shape (16, e_dim) ---
    x = jax.random.normal(kx, (16, E_DIM), dtype=jnp.float32)
    quant_t, diff_t = quantize_forward(x, codebook, training=True)
    quant_e, idx_e = quantize_forward(x, codebook, training=False)
    jax.block_until_ready((quant_t, diff_t, quant_e, idx_e))
    _check(x, codebook, quant_t, diff=diff_t, tag="small/train")
    _check(x, codebook, quant_e, idx=idx_e, tag="small/eval")
    assert np.array_equal(np.asarray(quant_t), np.asarray(quant_e))

    # --- multi-tile case: 600 rows with 256-row tiles -> grid=3, partial last block ---
    x_big = jax.random.normal(kx2, (600, E_DIM), dtype=jnp.float32)
    quant_bt, diff_bt = quantize_forward(x_big, codebook, training=True, tm_max=256)
    quant_be, idx_be = quantize_forward(x_big, codebook, training=False, tm_max=256)
    jax.block_until_ready((quant_bt, diff_bt, quant_be, idx_be))
    _check(x_big, codebook, quant_bt, diff=diff_bt, tag="big/train")
    _check(x_big, codebook, quant_be, idx=idx_be, tag="big/eval")
    assert np.array_equal(np.asarray(quant_bt), np.asarray(quant_be))

    # TODO(synk): EMA codebook update (decay/eps) and straight-through gradients are
    # training-state/backward concerns, not part of this forward pass.
    print("KERNEL_OK")
</pallas_src>

<mosaic_0001>
module attributes {stable_mosaic.version = 11 : i64} {
  func.func @_quantize_train_kernel(%arg0: i32, %arg1: memref<16x32xf32, #tpu.memory_space<vmem>>, %arg2: memref<32x128xf32, #tpu.memory_space<vmem>>, %arg3: memref<128x32xf32, #tpu.memory_space<vmem>>, %arg4: memref<1x128xf32, #tpu.memory_space<vmem>>, %arg5: memref<16x32xf32, #tpu.memory_space<vmem>>, %arg6: memref<1x8x128xf32, #tpu.memory_space<vmem>>) attributes {dimension_semantics = [#tpu.dimension_semantics<parallel>], iteration_bounds = array<i64: 1>, scalar_prefetch = 0 : i64, scratch_operands = 0 : i64, tpu.core_type = #tpu.core_type<tc>, window_params = [{transform_indices = @transform_0, window_bounds = array<i64: 16, 32>}, {pipeline_mode = #tpu.pipeline_mode<synchronous>, transform_indices = @transform_1, window_bounds = array<i64: 32, 128>}, {pipeline_mode = #tpu.pipeline_mode<synchronous>, transform_indices = @transform_2, window_bounds = array<i64: 128, 32>}, {pipeline_mode = #tpu.pipeline_mode<synchronous>, transform_indices = @transform_3, window_bounds = array<i64: 1, 128>}, {transform_indices = @transform_4, window_bounds = array<i64: 16, 32>}, {transform_indices = @transform_5, window_bounds = array<i64: 1, 8, 128>}]} {
    %c0 = arith.constant 0 : index
    %c0_0 = arith.constant 0 : index
    %0 = vector.load %arg1[%c0, %c0_0] : memref<16x32xf32, #tpu.memory_space<vmem>>, vector<16x32xf32>
    %c0_1 = arith.constant 0 : index
    %c0_2 = arith.constant 0 : index
    %1 = vector.load %arg2[%c0_1, %c0_2] : memref<32x128xf32, #tpu.memory_space<vmem>>, vector<32x128xf32>
    %c0_3 = arith.constant 0 : index
    %c0_4 = arith.constant 0 : index
    %2 = vector.load %arg3[%c0_3, %c0_4] : memref<128x32xf32, #tpu.memory_space<vmem>>, vector<128x32xf32>
    %c0_5 = arith.constant 0 : index
    %c0_6 = arith.constant 0 : index
    %3 = vector.load %arg4[%c0_5, %c0_6] : memref<1x128xf32, #tpu.memory_space<vmem>>, vector<1x128xf32>
    %cst = arith.constant dense<0.000000e+00> : vector<16x128xf32>
    %4 = tpu.matmul %0, %1, %cst {dimension_numbers = #tpu.dot_dimension_numbers<[1], [0], [0], [1], [0, 0, 1, 1], [], []>} : vector<16x32xf32>, vector<32x128xf32>, vector<16x128xf32> -> vector<16x128xf32>
    %cst_7 = arith.constant 2.000000e+00 : f32
    %5 = vector.broadcast %cst_7 : f32 to vector<16x128xf32>
    %6 = arith.mulf %5, %4 : vector<16x128xf32>
    %7 = vector.broadcast %3 : vector<1x128xf32> to vector<16x128xf32>
    %8 = arith.subf %7, %6 : vector<16x128xf32>
    %cst_8 = arith.constant dense<0x7F800000> : vector<16xf32>
    %9 = vector.multi_reduction <minimumf>, %8, %cst_8 [1] : vector<16x128xf32> to vector<16xf32>
    %10 = vector.shape_cast %9 : vector<16xf32> to vector<16x1xf32>
    %11 = tpu.iota {dimensions = array<i32: 1>} : vector<1x128xi32>
    %12 = vector.broadcast %10 : vector<16x1xf32> to vector<16x128xf32>
    %13 = arith.cmpf ole, %8, %12 : vector<16x128xf32>
    %c128_i32 = arith.constant 128 : i32
    %14 = vector.shape_cast %11 : vector<1x128xi32> to vector<1x128xi32>
    %15 = vector.broadcast %14 : vector<1x128xi32> to vector<16x128xi32>
    %16 = vector.broadcast %c128_i32 : i32 to vector<16x128xi32>
    %17 = arith.select %13, %15, %16 : vector<16x128xi1>, vector<16x128xi32>
    %cst_9 = arith.constant dense<2147483647> : vector<16xi32>
    %18 = vector.multi_reduction <minsi>, %17, %cst_9 [1] : vector<16x128xi32> to vector<16xi32>
    %19 = vector.shape_cast %18 : vector<16xi32> to vector<16x1xi32>
    %20 = vector.broadcast %11 : vector<1x128xi32> to vector<16x128xi32>
    %21 = vector.broadcast %19 : vector<16x1xi32> to vector<16x128xi32>
    %22 = arith.cmpi eq, %20, %21 : vector<16x128xi32>
    %23 = arith.extui %22 : vector<16x128xi1> to vector<16x128xi32>
    %24 = arith.sitofp %23 : vector<16x128xi32> to vector<16x128xf32>
    %cst_10 = arith.constant dense<0.000000e+00> : vector<16x32xf32>
    %25 = tpu.matmul %24, %2, %cst_10 {dimension_numbers = #tpu.dot_dimension_numbers<[1], [0], [0], [1], [0, 0, 1, 1], [], []>} : vector<16x128xf32>, vector<128x32xf32>, vector<16x32xf32> -> vector<16x32xf32>
    %c0_11 = arith.constant 0 : index
    %c0_12 = arith.constant 0 : index
    %26 = vector.load %arg5[%c0_11, %c0_12] : memref<16x32xf32, #tpu.memory_space<vmem>>, vector<16x32xf32>
    tpu.vector_store %arg5[%c0_11, %c0_12], %25 {strides = array<i32>} : memref<16x32xf32, #tpu.memory_space<vmem>>, vector<16x32xf32>,
    %27 = arith.mulf %0, %0 : vector<16x32xf32>
    %cst_13 = arith.constant dense<0.000000e+00> : vector<16xf32>
    %28 = vector.multi_reduction <add>, %27, %cst_13 [1] : vector<16x32xf32> to vector<16xf32>
    %29 = vector.shape_cast %28 : vector<16xf32> to vector<16x1xf32>
    %30 = arith.addf %29, %10 : vector<16x1xf32>
    %c16_i32 = arith.constant 16 : i32
    %31 = arith.muli %arg0, %c16_i32 : i32
    %32 = tpu.iota {dimensions = array<i32: 0>} : vector<16x1xi32>
    %33 = vector.broadcast %31 : i32 to vector<16x1xi32>
    %34 = arith.addi %33, %32 : vector<16x1xi32>
    %c16_i32_14 = arith.constant 16 : i32
    %35 = vector.broadcast %c16_i32_14 : i32 to vector<16x1xi32>
    %36 = arith.cmpi slt, %34, %35 : vector<16x1xi32>
    %cst_15 = arith.constant 0.000000e+00 : f32
    %37 = vector.broadcast %cst_15 : f32 to vector<16x1xf32>
    %38 = arith.select %36, %30, %37 : vector<16x1xi1>, vector<16x1xf32>
    %39 = vector.shape_cast %38 : vector<16x1xf32> to vector<1x16x1xf32>
    %cst_16 = arith.constant dense<0.000000e+00> : vector<1xf32>
    %40 = vector.multi_reduction <add>, %39, %cst_16 [1, 2] : vector<1x16x1xf32> to vector<1xf32>
    %41 = vector.shape_cast %40 : vector<1xf32> to vector<1x1x1xf32>
    %42 = vector.extract %41[0, 0, 0] : f32 from vector<1x1x1xf32>
    %43 = vector.broadcast %42 : f32 to vector<1x8x128xf32>
    %c0_17 = arith.constant 0 : index
    %c0_18 = arith.constant 0 : index
    %c0_19 = arith.constant 0 : index
    %44 = vector.load %arg6[%c0_17, %c0_18, %c0_19] : memref<1x8x128xf32, #tpu.memory_space<vmem>>, vector<1x8x128xf32>
    tpu.vector_store %arg6[%c0_17, %c0_18, %c0_19], %43 {strides = array<i32>} : memref<1x8x128xf32, #tpu.memory_space<vmem>>, vector<1x8x128xf32>,
    return
  }
  func.func @transform_0(%arg0: i32) -> (i32, i32) {
    %c0_i32 = arith.constant 0 : i32
    %c0_i32_0 = arith.constant 0 : i32
    return %arg0, %c0_i32 : i32, i32
  }
  func.func @transform_1(%arg0: i32) -> (i32, i32) {
    %c0_i32 = arith.constant 0 : i32
    %c0_i32_0 = arith.constant 0 : i32
    %c0_i32_1 = arith.constant 0 : i32
    return %c0_i32, %c0_i32_0 : i32, i32
  }
  func.func @transform_2(%arg0: i32) -> (i32, i32) {
    %c0_i32 = arith.constant 0 : i32
    %c0_i32_0 = arith.constant 0 : i32
    %c0_i32_1 = arith.constant 0 : i32
    return %c0_i32, %c0_i32_0 : i32, i32
  }
  func.func @transform_3(%arg0: i32) -> (i32, i32) {
    %c0_i32 = arith.constant 0 : i32
    %c0_i32_0 = arith.constant 0 : i32
    %c0_i32_1 = arith.constant 0 : i32
    return %c0_i32, %c0_i32_0 : i32, i32
  }
  func.func @transform_4(%arg0: i32) -> (i32, i32) {
    %c0_i32 = arith.constant 0 : i32
    %c0_i32_0 = arith.constant 0 : i32
    return %arg0, %c0_i32 : i32, i32
  }
  func.func @transform_5(%arg0: i32) -> (i32, i32, i32) {
    %c0_i32 = arith.constant 0 : i32
    %c0_i32_0 = arith.constant 0 : i32
    %c0_i32_1 = arith.constant 0 : i32
    return %arg0, %c0_i32, %c0_i32_0 : i32, i32, i32
  }
}

</mosaic_0001>

<bundles_post_ra>
// kernel: tpu_custom_call.1
= control target key start
LH: loop header
LB: loop body
LE: loop exit
PB: predicated region body
PF: predicated region fallthrough
CT: control target
= control target key end

     0   :  { %11 = vsyncpa [#allocation3], 0  ;;  %s428_s0 = inlined_call_operand.vmem [shape: f32[16,32], index: 0, kind: input, shape index: {}]   ;;  %s429_s1 = inlined_call_operand.vmem [shape: f32[32,128], index: 1, kind: input, shape index: {}]   ;;  %s430_s2 = inlined_call_operand.vmem [shape: f32[128,32], index: 2, kind: input, shape index: {}]   ;;  %s431_s3 = inlined_call_operand.vmem [shape: f32[1,128], index: 3, kind: input, shape index: {}]   ;;  %s432_s4 = inlined_call_operand.hbm [shape: f32[16,32], index: 4, kind: output, shape index: {0}]   ;;  %s433_s5 = inlined_call_operand.hbm [shape: f32[1,8,128], index: 5, kind: output, shape index: {1}]  }
   0x1   :  { %v26_v0 = vld [vmem:[%s429_s1 + $0x18] sm:$0xff]  ;;  %v25_v1 = vld [vmem:[%s429_s1 + $0x10] sm:$0xff]  ;;  %v24_v2 = vld [vmem:[%s429_s1 + $0x8] sm:$0xff] }
   0x2   :  { %63 = vmatpush.msra.mxu0 %v26_v0 }
   0x3   :  { %12 = vsyncpa [#allocation5], 0  ;;  %v23_v3 = vld [vmem:[%s429_s1] sm:$0xff]  ;;  %vm44_vm0 = vcmask 261120   ;;  %v22_v5 = vld [vmem:[%s428_s0 + $0x8] sm:$0xff]  ;;  %v85_v15 = vlaneseq  ;;  %vm171_vm5 = vcmask 7168  }
   0x4   :  { %64 = vmatpush.msra.mxu0 %v25_v1  ;;  %v21_v4 = vld [vmem:[%s428_s0] sm:$0xff]  ;;  %v151_v25 = vmul.f32 %v22_v5, %v22_v5  ;;  %v42_v27 = vld [vmem:[%s430_s2 + $0x78] sm:$0xff]  ;;  %v41_v28 = vld [vmem:[%s430_s2 + $0x70] sm:$0xff]  ;;  %v302_v0 = vmov 1.0   ;;  %s206_s11 = sshll.u32 %s433_s5, 4  ;;  %s304_s13 = smov [#allocation2]   ;;  %s207_s11 = int_to_ptr.hbm [resolvable:$true] %s206_s11 }
   0x5   :  { %v249_v9 = vld [vmem:[%s431_s3] ss:$0 sm:$0xff]  ;;  %v150_v13 = vmul.f32 %v21_v4, %v21_v4  ;;  %v361_v16 = vand.u32 127, %v85_v15  ;;  %226 = vmatpush.msra.mxu2 %v42_v27  ;;  %125 = vmatpush.msra.mxu1 %v42_v27  ;;  %v40_v29 = vld [vmem:[%s430_s2 + $0x68] sm:$0xff]  ;;  %v38_v32 = vld [vmem:[%s430_s2 + $0x58] sm:$0xff]  ;;  %s190_s14 = sshll.u32 %s304_s13, 4  ;;  %s191_s14 = int_to_ptr.vmem [resolvable:$true] %s190_s14 }
   0x6   :  { %65 = vmatpush.msra.mxu0 %v24_v2  ;;  %v155_v26 = vsel %vm44_vm0, %v151_v25, 0.0  ;;  %v39_v30 = vld [vmem:[%s430_s2 + $0x60] sm:$0xff]  ;;  %v37_v33 = vld [vmem:[%s430_s2 + $0x50] sm:$0xff]  ;;  %v36_v36 = vld [vmem:[%s430_s2 + $0x48] sm:$0xff]  ;;  %s192_s17 = sshll.u32 %s432_s4, 4  ;;  %s305_s5 = smov 128   ;;  %s193_s17 = int_to_ptr.hbm [resolvable:$true] %s192_s17 }
   0x7   :  { %v152_v14 = vsel %vm44_vm0, %v150_v13, 0.0  ;;  %227 = vmatpush.msra.mxu2 %v41_v28  ;;  %126 = vmatpush.msra.mxu1 %v41_v28  ;;  %v35_v38 = vld [vmem:[%s430_s2 + $0x40] sm:$0xff]  ;;  %v34_v40 = vld [vmem:[%s430_s2 + $0x38] sm:$0xff]  ;;  %v33_v41 = vld [vmem:[%s430_s2 + $0x30] sm:$0xff]  ;;  %s306_s18 = smov 8  }
   0x8   :  { %66 = vmatpush.msra.mxu0 %v23_v3  ;;  %v32_v44 = vld [vmem:[%s430_s2 + $0x28] sm:$0xff]  ;;  %v31_v46 = vld [vmem:[%s430_s2 + $0x20] sm:$0xff]  ;;  %v30_v48 = vld [vmem:[%s430_s2 + $0x18] sm:$0xff] }
   0x9   :  { %220 = vmatmul.msk.f32.vlgmr.msra.gmra.mxu0 %vm44_vm0, %v21_v4  ;;  %228 = vmatpush.msra.mxu2 %v40_v29  ;;  %v29_v55 = vld [vmem:[%s430_s2 + $0x10] sm:$0xff]  ;;  %v28_v56 = vld [vmem:[%s430_s2 + $0x8] sm:$0xff]  ;;  %v27_v57 = vld [vmem:[%s430_s2] sm:$0xff]  ;;  %s303_s2 = smov [#allocation4]  }
   0xa   :  { %127 = vmatpush.msra.mxu1 %v40_v29  ;;  %s204_s8 = sshll.u32 %s303_s2, 4  ;;  %s205_s8 = int_to_ptr.vmem [resolvable:$true] %s204_s8 }
   0xb   :  { %229 = vmatpush.msra.mxu2 %v39_v30 }
   0xc   :  { %128 = vmatpush.msra.mxu1 %v39_v30 }
   0xd   :  { %230 = vmatpush.msra.mxu2 %v38_v32 }
   0xe   :  { %129 = vmatpush.msra.mxu1 %v38_v32 }
   0xf   :  { %231 = vmatpush.msra.mxu2 %v37_v33 }
  0x10   :  { %130 = vmatpush.msra.mxu1 %v37_v33 }
  0x11   :  { %221 = vmatmul.msk.f32.gmra.mxu0 %vm44_vm0, %v22_v5  ;;  %232 = vmatpush.msra.mxu2 %v36_v36 }
  0x12   :  { %131 = vmatpush.msra.mxu1 %v36_v36 }
  0x13   :  { %233 = vmatpush.msra.mxu2 %v35_v38 }
  0x14   :  { %132 = vmatpush.msra.mxu1 %v35_v38 }
  0x15   :  { %234 = vmatpush.msra.mxu2 %v34_v40 }
  0x16   :  { %133 = vmatpush.msra.mxu1 %v34_v40 }
  0x17   :  { %235 = vmatpush.msra.mxu2 %v33_v41 }
  0x18   :  { %134 = vmatpush.msra.mxu1 %v33_v41 }
  0x19   :  { %236 = vmatpush.msra.mxu2 %v32_v44 }
  0x1a   :  { %135 = vmatpush.msra.mxu1 %v32_v44 }
  0x1b   :  { %237 = vmatpush.msra.mxu2 %v31_v46 }
  0x1c   :  { %136 = vmatpush.msra.mxu1 %v31_v46 }
  0x1d   :  { %238 = vmatpush.msra.mxu2 %v30_v48 }
  0x1e   :  { %137 = vmatpush.msra.mxu1 %v30_v48 }
  0x1f   :  { %239 = vmatpush.msra.mxu2 %v29_v55 }
  0x20   :  { %138 = vmatpush.msra.mxu1 %v29_v55 }
  0x21   :  { %240 = vmatpush.msra.mxu2 %v28_v56 }
  0x22   :  { %139 = vmatpush.msra.mxu1 %v28_v56 }
  0x23   :  { %241 = vmatpush.msra.mxu2 %v27_v57 }
  0x24   :  { %140 = vmatpush.msra.mxu1 %v27_v57 }
  0x86   :  { %v68_v6 = vpop.f32.mrf.mxu0 }
  0x87   :  { %v74_v11 = vmul.f32 2.0, %v68_v6 }
  0x89   :  { %v79_v12 = vsub.f32 %v249_v9, %v74_v11 }
  0x8e   :  { %v71_v7 = vpop.f32.mrf.mxu0 }
  0x8f   :  { %v75_v8 = vmul.f32 2.0, %v71_v7 }
  0x91   :  { %v80_v10 = vsub.f32 %v249_v9, %v75_v8 }
  0x93   :  { %83 = vmin.xlane.f32.xlu0 %v80_v10 }
  0x9b   :  { %81 = vmin.xlane.f32.xlu0 %v79_v12 }
  0xa3   :  { %153 = vadd.xlane.f32.xlu0 %v152_v14 }
 0x106   :  { %v363_v17 = vpop.xlane.xlu0 %83 }
 0x107   :  { %vm88_vm1 = vcmp.le.f32.partialorder %v80_v10, %v363_v17 }
 0x108   :  { %v90_v18 = vsel %vm88_vm1, %v361_v16, 128 }
 0x109   :  { %v106_v19 = vshra.s32 %v90_v18, 16  ;;  %v105_v31 = vand.u32 65535, %v90_v18 }
 0x10b   :  { %v108_v20 = vcvt.s32.f32 %v106_v19  ;;  %v107_v35 = vcvt.s32.f32 %v105_v31 }
 0x10d   :  { %109 = vmin.xlane.f32.xlu1 %v108_v20 }
 0x10e   :  { %v82_v21 = vpop.xlane.xlu0 %81 }
 0x10f   :  { %vm87_vm2 = vcmp.le.f32.partialorder %v79_v12, %v82_v21 }
 0x110   :  { %v89_v22 = vsel %vm87_vm2, %v361_v16, 128 }
 0x111   :  { %v92_v23 = vshra.s32 %v89_v22, 16  ;;  %v91_v39 = vand.u32 65535, %v89_v22 }
 0x113   :  { %v94_v24 = vcvt.s32.f32 %v92_v23  ;;  %v93_v43 = vcvt.s32.f32 %v91_v39 }
 0x115   :  { %95 = vmin.xlane.f32.xlu1 %v94_v24 }
 0x116   :  { %v154_v47 = vpop.xlane.xlu0 %153 }
 0x117   :  { %v158_v49 = vadd.f32 %v154_v47, %v82_v21 }
 0x119   :  { %v172_v52 = vsel %vm171_vm5, %v158_v49, 0.0 }
 0x11d   :  { %156 = vadd.xlane.f32.xlu1 %v155_v26 }
 0x180   :  { %v110_v34 = vpop.xlane.xlu1 %109 }
 0x181   :  { %vm111_vm3 = vcmp.eq.f32.partialorder %v108_v20, %v110_v34  ;;  %v116_v58 = vcvt.f32.s32 %v110_v34 }
 0x182   :  { %v112_v37 = vsel %vm111_vm3, %v107_v35, inf }
 0x183   :  { %113 = vmin.xlane.f32.xlu2 %v112_v37  ;;  %v117_v60 = vshll.u32 %v116_v58, 16 }
 0x188   :  { %v96_v42 = vpop.xlane.xlu1 %95 }
 0x189   :  { %vm97_vm4 = vcmp.eq.f32.partialorder %v94_v24, %v96_v42  ;;  %v102_v63 = vcvt.f32.s32 %v96_v42 }
 0x18a   :  { %v98_v45 = vsel %vm97_vm4, %v93_v43, inf }
 0x18b   :  { %99 = vmin.xlane.f32.xlu2 %v98_v45  ;;  %v103_v2 = vshll.u32 %v102_v63, 16 }
 0x190   :  { %v157_v50 = vpop.xlane.xlu1 %156 }
 0x191   :  { %v159_v51 = vadd.f32 %v157_v50, %v363_v17 }
 0x193   :  { %v173_v53 = vsel %vm171_vm5, %v159_v51, 0.0 }
 0x194   :  { %v174_v54 = vadd.f32 %v173_v53, %v172_v52 }
 0x196   :  { %175 = vadd.xlane.f32.xlu2 %v174_v54 }
 0x1f6   :  { %v114_v59 = vpop.xlane.xlu2 %113 }
 0x1f7   :  { %v115_v61 = vcvt.f32.s32 %v114_v59 }
 0x1f9   :  { %v118_v62 = vadd.s32 %v117_v60, %v115_v61 }
 0x1fb   :  { %vm120_vm6 = vcmp.eq.s32.totalorder %v361_v16, %v118_v62 }
 0x1fc   :  { %225 = vmatmul.msk.f32.vlgmr.msra.gmra.mxu2 %vm120_vm6, %v302_v0 }
 0x1fe   :  { %v100_v1 = vpop.xlane.xlu2 %99 }
 0x1ff   :  { %v101_v3 = vcvt.f32.s32 %v100_v1 }
 0x201   :  { %v104_v4 = vadd.s32 %v103_v2, %v101_v3 }
 0x203   :  { %vm119_vm7 = vcmp.eq.s32.totalorder %v361_v16, %v104_v4 }
 0x204   :  { %224 = vmatmul.msk.f32.vlgmr.msra.gmra.mxu1 %vm119_vm7, %v302_v0 }
 0x209   :  { %v176_v5 = vpop.xlane.xlu2 %175 }
 0x20a   :  { %v177_v6 = vrot.slane %v176_v5, 4 }
 0x20c   :  { %v178_v7 = vadd.f32 %v177_v6, %v176_v5 }
 0x20e   :  { %v179_v8 = vrot.slane %v178_v7, 2 }
 0x210   :  { %v180_v9 = vadd.f32 %v179_v8, %v178_v7 }
 0x212   :  { %v181_v10 = vrot.slane %v180_v9, 1 }
 0x214   :  { %v182_v11 = vadd.f32 %v181_v10, %v180_v9 }
 0x216   :  { %242 = vpush %v182_v11 }
 0x247   :  { %s243_s12 = spop %242 }
 0x248   :  { %v184_v12 = vstv %s243_s12 }
 0x249   :  { %185 = vst [vmem:[#allocation4] sm:$0xff] %v184_v12 }
 0x24a   :  { %209 = dma.vmem_to_hbm [thread:$0]  %s205_s8, 128, %s207_s11, [#allocation5]  }
 0x27f   :  { %v145_v13 = vpop.f32.mrf.mxu2 }
 0x280   :  { %149 = vst.msk [vmem:[#allocation2 + $0x8] sm:$0xff] %vm44_vm0, %v145_v13 }
 0x281   :  { %v142_v14 = vpop.f32.mrf.mxu1 }
 0x282   :  { %148 = vst.msk [vmem:[#allocation2] sm:$0xff] %vm44_vm0, %v142_v14 }
 0x283   :  { %198 = dma.vmem_to_hbm [thread:$0]  %s191_s14, 256, %s193_s17, [#allocation3], %s305_s5, %s305_s5, %s306_s18  }
 0x284   :  { %298 = dma.done.wait [#allocation3], 256  }
 0x285   :  { %299 = vsyncadd [#allocation3], 4294967040 }
 0x286   :  { %300 = dma.done.wait [#allocation5], 128  }
 0x287   :  { %301 = vsyncadd [#allocation5], 4294967168 }
 0x288   :  { %218 = vsyncpa [#allocation3], 1 }
 0x289   :  { %219 = vsyncpa [#allocation5], 1 }

</bundles_post_ra>
